<compile_context>
chip_gen: v7x
topology: tpu7x:2x2x1
jax: 0.10.0
libtpu: 0.0.40
codegen_flags: <defaults>
</compile_context>

<pallas_src>
import functools

import jax
import jax.numpy as jnp
from jax.experimental import pallas as pl
from jax.experimental.pallas import tpu as pltpu


# ----------------------------------------------------------------------------
# Tiling helpers
# ----------------------------------------------------------------------------
def _round_up(x: int, m: int) -> int:
    return ((x + m - 1) // m) * m


def _choose_tile_n(n: int, c: int, num_wide_f32_inputs: int,
                   vmem_budget_bytes: int = 24 * 1024 * 1024) -> int:
    """Largest batch tile (multiple of 8, capped at 512) whose double-buffered
    [TN, C] f32 input working set fits comfortably in VMEM on every TPU
    generation (v7x has only 64 MiB physical / 32 MiB scoped default)."""
    bytes_per_row = num_wide_f32_inputs * 2 * c * 4  # inputs x 2 buffers x f32
    tn = vmem_budget_bytes // max(bytes_per_row, 1)
    tn = max(8, min(512, (tn // 8) * 8))
    tn = min(tn, _round_up(n, 8))
    return int(tn)
    # TODO(synk): for very large vocab C (>= ~64k) add a second "arbitrary"
    # grid axis over C with an online-logsumexp accumulator instead of full-C
    # row tiles.


# ----------------------------------------------------------------------------
# Kernels (each grid step reduces one [TN, C] tile to one scalar partial sum)
# ----------------------------------------------------------------------------
def _soft_target_ce_kernel(pred_ref, tgt_ref, out_ref, *, n_rows, tile_n):
    """Soft-target CE partial sum:  sum_rows( lse*sum(t) - sum(t*logits) )."""
    logits = pred_ref[...].astype(jnp.float32)                 # [TN, C]
    t = tgt_ref[...].astype(jnp.float32)                       # [TN, C]
    tn, _ = logits.shape

    m = jnp.max(logits, axis=-1, keepdims=True)
    lse = jnp.log(jnp.sum(jnp.exp(logits - m), axis=-1, keepdims=True)) + m  # [TN,1]
    t_sum = jnp.sum(t, axis=-1, keepdims=True)                               # [TN,1]
    t_dot_logits = jnp.sum(t * logits, axis=-1, keepdims=True)               # [TN,1]

    # sum_c(-t * log_softmax(p)) == lse * sum(t) - sum(t * logits)
    per_sample = lse * t_sum - t_dot_logits                                  # [TN,1]

    # Mask rows past the true batch size (padding of the last partial tile).
    row = pl.program_id(0) * tile_n + jax.lax.broadcasted_iota(
        jnp.int32, (tn, 1), 0)
    per_sample = jnp.where(row < n_rows, per_sample, 0.0)

    out_ref[0, 0] = jnp.sum(per_sample)


def _label_smoothing_ce_kernel(pred_ref, tgt_ref, out_ref, *, smoothing,
                               n_rows, tile_n):
    """Label-smoothing CE partial sum with hard integer labels.

    per_sample = lse - ((1-s) * logit_at_target + s * mean(logits))
    (equivalent to (1-s)*nll + s*smooth without materializing logprobs).
    """
    logits = pred_ref[...].astype(jnp.float32)                 # [TN, C]
    tn, c = logits.shape

    m = jnp.max(logits, axis=-1, keepdims=True)
    lse = jnp.log(jnp.sum(jnp.exp(logits - m), axis=-1, keepdims=True)) + m  # [TN,1]

    classes = jax.lax.broadcasted_iota(jnp.int32, (tn, c), 1)  # [TN, C]
    onehot_pick = jnp.where(classes == tgt_ref[...], logits, 0.0)
    logit_t = jnp.sum(onehot_pick, axis=-1, keepdims=True)     # [TN, 1]
    mean_logits = jnp.mean(logits, axis=-1, keepdims=True)     # [TN, 1]

    confidence = 1.0 - smoothing
    per_sample = lse - (confidence * logit_t + smoothing * mean_logits)

    row = pl.program_id(0) * tile_n + jax.lax.broadcasted_iota(
        jnp.int32, (tn, 1), 0)
    per_sample = jnp.where(row < n_rows, per_sample, 0.0)

    out_ref[0, 0] = jnp.sum(per_sample)


# ----------------------------------------------------------------------------
# Wrappers (glue in plain JAX) -- jit-friendly, return DeviceArrays
# ----------------------------------------------------------------------------
def soft_target_cross_entropy(pred, target, tile_n=None):
    n, c = pred.shape
    tn = tile_n if tile_n is not None else _choose_tile_n(n, c, num_wide_f32_inputs=2)
    num_tiles = pl.cdiv(n, tn)
    kernel = functools.partial(_soft_target_ce_kernel, n_rows=n, tile_n=tn)
    partials = pl.pallas_call(
        kernel,
        out_shape=jax.ShapeDtypeStruct((num_tiles, 1), jnp.float32),
        grid=(num_tiles,),
        in_specs=[
            pl.BlockSpec((tn, c), lambda i: (i, 0)),
            pl.BlockSpec((tn, c), lambda i: (i, 0)),
        ],
        out_specs=pl.BlockSpec((1, 1), lambda i: (i, 0),
                               memory_space=pltpu.MemorySpace.SMEM),
        compiler_params=pltpu.CompilerParams(
            dimension_semantics=("parallel",)),
    )(pred, target)
    return jnp.sum(partials) / jnp.float32(n)


def label_smoothing_cross_entropy(pred, target, smoothing=0.1, tile_n=None):
    n, c = pred.shape
    tn = tile_n if tile_n is not None else _choose_tile_n(n, c, num_wide_f32_inputs=1)
    num_tiles = pl.cdiv(n, tn)
    target2d = target.reshape(-1).astype(jnp.int32).reshape(n, 1)
    kernel = functools.partial(_label_smoothing_ce_kernel, smoothing=smoothing,
                               n_rows=n, tile_n=tn)
    partials = pl.pallas_call(
        kernel,
        out_shape=jax.ShapeDtypeStruct((num_tiles, 1), jnp.float32),
        grid=(num_tiles,),
        in_specs=[
            pl.BlockSpec((tn, c), lambda i: (i, 0)),
            pl.BlockSpec((tn, 1), lambda i: (i, 0)),
        ],
        out_specs=pl.BlockSpec((1, 1), lambda i: (i, 0),
                               memory_space=pltpu.MemorySpace.SMEM),
        compiler_params=pltpu.CompilerParams(
            dimension_semantics=("parallel",)),
    )(pred, target2d)
    return jnp.sum(partials) / jnp.float32(n)


class SmoothCELoss:
    """JAX/Pallas port of theseus SmoothCELoss (forward pass only)."""

    def __init__(self, smoothing: float = 0.1):
        self.smoothing = smoothing

    def forward(self, outputs, batch):
        pred = outputs["outputs"]
        target = batch["targets"]
        if pred.shape == target.shape:
            loss = soft_target_cross_entropy(pred, target)
        else:
            loss = label_smoothing_cross_entropy(
                pred, target.reshape(-1), smoothing=self.smoothing
            )
        # Keep the device array in the dict (jit-friendly, no forced host
        # sync); the caller can float() it outside the training step.
        loss_dict = {"CE": loss}
        return loss, loss_dict


# ----------------------------------------------------------------------------
# Reference (pure JAX) for sanity check
# ----------------------------------------------------------------------------
def _ref_soft(pred, target):
    logprobs = jax.nn.log_softmax(pred.astype(jnp.float32), axis=-1)
    return jnp.mean(jnp.sum(-target.astype(jnp.float32) * logprobs, axis=-1))


def _ref_smooth(pred, target, smoothing=0.1):
    logprobs = jax.nn.log_softmax(pred.astype(jnp.float32), axis=-1)
    nll = -jnp.take_along_axis(logprobs, target.reshape(-1, 1), axis=-1)[:, 0]
    smooth = -jnp.mean(logprobs, axis=-1)
    return jnp.mean((1.0 - smoothing) * nll + smoothing * smooth)


if __name__ == "__main__":
    key = jax.random.PRNGKey(0)
    k1, k2, k3, k4, k5, k6 = jax.random.split(key, 6)

    criterion = SmoothCELoss(smoothing=0.1)

    # --- small shapes: batch=8, num_classes=32 ---
    N, C = 8, 32
    pred = jax.random.normal(k1, (N, C), dtype=jnp.float32)

    # hard-label path (LabelSmoothingCrossEntropy)
    hard_targets = jax.random.randint(k2, (N,), 0, C, dtype=jnp.int32)
    loss_hard, dict_hard = criterion.forward(
        {"outputs": pred}, {"targets": hard_targets})
    jax.block_until_ready(loss_hard)
    ref_hard = _ref_smooth(pred, hard_targets, smoothing=0.1)
    assert jnp.allclose(loss_hard, ref_hard, atol=1e-5, rtol=1e-5), (
        loss_hard, ref_hard)

    # soft-target path (SoftTargetCrossEntropy)
    soft_targets = jax.nn.softmax(jax.random.normal(k3, (N, C)), axis=-1)
    loss_soft, dict_soft = criterion.forward(
        {"outputs": pred}, {"targets": soft_targets})
    jax.block_until_ready(loss_soft)
    ref_soft = _ref_soft(pred, soft_targets)
    assert jnp.allclose(loss_soft, ref_soft, atol=1e-5, rtol=1e-5), (
        loss_soft, ref_soft)

    # --- ragged batch (N not a multiple of the tile) + multi-tile grid:
    #     exercise the padded-row masking and per-tile partial-sum path.
    N2, C2 = 20, 32
    pred2 = jax.random.normal(k4, (N2, C2), dtype=jnp.float32)
    hard2 = jax.random.randint(k5, (N2,), 0, C2, dtype=jnp.int32)
    soft2 = jax.nn.softmax(jax.random.normal(k6, (N2, C2)), axis=-1)

    loss_hard2 = label_smoothing_cross_entropy(pred2, hard2, smoothing=0.1,
                                               tile_n=8)
    jax.block_until_ready(loss_hard2)
    assert jnp.allclose(loss_hard2, _ref_smooth(pred2, hard2, 0.1),
                        atol=1e-5, rtol=1e-5), loss_hard2

    loss_soft2 = soft_target_cross_entropy(pred2, soft2, tile_n=8)
    jax.block_until_ready(loss_soft2)
    assert jnp.allclose(loss_soft2, _ref_soft(pred2, soft2),
                        atol=1e-5, rtol=1e-5), loss_soft2

    print("KERNEL_OK")
</pallas_src>

<mosaic_0001>
module attributes {stable_mosaic.version = 11 : i64} {
  func.func @_label_smoothing_ce_kernel(%arg0: i32, %arg1: memref<8x32xf32, #tpu.memory_space<vmem>>, %arg2: memref<8x1xi32, #tpu.memory_space<vmem>>, %arg3: memref<1x1xf32, #tpu.memory_space<smem>>) attributes {dimension_semantics = [#tpu.dimension_semantics<parallel>], iteration_bounds = array<i64: 1>, scalar_prefetch = 0 : i64, scratch_operands = 0 : i64, tpu.core_type = #tpu.core_type<tc>, window_params = [{transform_indices = @transform_0, window_bounds = array<i64: 8, 32>}, {transform_indices = @transform_1, window_bounds = array<i64: 8, 1>}, {transform_indices = @transform_2, window_bounds = array<i64: 1, 1>}]} {
    %c0 = arith.constant 0 : index
    %c0_0 = arith.constant 0 : index
    %0 = vector.load %arg1[%c0, %c0_0] : memref<8x32xf32, #tpu.memory_space<vmem>>, vector<8x32xf32>
    %cst = arith.constant dense<0xFF800000> : vector<8xf32>
    %1 = vector.multi_reduction <maximumf>, %0, %cst [1] : vector<8x32xf32> to vector<8xf32>
    %2 = vector.shape_cast %1 : vector<8xf32> to vector<8x1xf32>
    %3 = vector.broadcast %2 : vector<8x1xf32> to vector<8x32xf32>
    %4 = arith.subf %0, %3 : vector<8x32xf32>
    %5 = math.exp %4 : vector<8x32xf32>
    %cst_1 = arith.constant dense<0.000000e+00> : vector<8xf32>
    %6 = vector.multi_reduction <add>, %5, %cst_1 [1] : vector<8x32xf32> to vector<8xf32>
    %7 = vector.shape_cast %6 : vector<8xf32> to vector<8x1xf32>
    %8 = math.log %7 : vector<8x1xf32>
    %9 = arith.addf %8, %2 : vector<8x1xf32>
    %10 = tpu.iota {dimensions = array<i32: 1>} : vector<8x32xi32>
    %c0_2 = arith.constant 0 : index
    %c0_3 = arith.constant 0 : index
    %11 = vector.load %arg2[%c0_2, %c0_3] : memref<8x1xi32, #tpu.memory_space<vmem>>, vector<8x1xi32>
    %12 = vector.broadcast %11 : vector<8x1xi32> to vector<8x32xi32>
    %13 = arith.cmpi eq, %10, %12 : vector<8x32xi32>
    %cst_4 = arith.constant 0.000000e+00 : f32
    %14 = vector.broadcast %cst_4 : f32 to vector<8x32xf32>
    %15 = arith.select %13, %0, %14 : vector<8x32xi1>, vector<8x32xf32>
    %cst_5 = arith.constant dense<0.000000e+00> : vector<8xf32>
    %16 = vector.multi_reduction <add>, %15, %cst_5 [1] : vector<8x32xf32> to vector<8xf32>
    %17 = vector.shape_cast %16 : vector<8xf32> to vector<8x1xf32>
    %cst_6 = arith.constant dense<0.000000e+00> : vector<8xf32>
    %18 = vector.multi_reduction <add>, %0, %cst_6 [1] : vector<8x32xf32> to vector<8xf32>
    %19 = vector.shape_cast %18 : vector<8xf32> to vector<8x1xf32>
    %cst_7 = arith.constant 3.200000e+01 : f32
    %20 = vector.broadcast %cst_7 : f32 to vector<8x1xf32>
    %21 = arith.divf %19, %20 : vector<8x1xf32>
    %cst_8 = arith.constant 0.899999976 : f32
    %22 = vector.broadcast %cst_8 : f32 to vector<8x1xf32>
    %23 = arith.mulf %22, %17 : vector<8x1xf32>
    %cst_9 = arith.constant 1.000000e-01 : f32
    %24 = vector.broadcast %cst_9 : f32 to vector<8x1xf32>
    %25 = arith.mulf %24, %21 : vector<8x1xf32>
    %26 = arith.addf %23, %25 : vector<8x1xf32>
    %27 = arith.subf %9, %26 : vector<8x1xf32>
    %c8_i32 = arith.constant 8 : i32
    %28 = arith.muli %arg0, %c8_i32 : i32
    %29 = tpu.iota {dimensions = array<i32: 0>} : vector<8x1xi32>
    %30 = vector.broadcast %28 : i32 to vector<8x1xi32>
    %31 = arith.addi %30, %29 : vector<8x1xi32>
    %c8_i32_10 = arith.constant 8 : i32
    %32 = vector.broadcast %c8_i32_10 : i32 to vector<8x1xi32>
    %33 = arith.cmpi slt, %31, %32 : vector<8x1xi32>
    %cst_11 = arith.constant 0.000000e+00 : f32
    %34 = vector.broadcast %cst_11 : f32 to vector<8x1xf32>
    %35 = arith.select %33, %27, %34 : vector<8x1xi1>, vector<8x1xf32>
    %36 = vector.shape_cast %35 : vector<8x1xf32> to vector<1x8x1xf32>
    %cst_12 = arith.constant dense<0.000000e+00> : vector<1xf32>
    %37 = vector.multi_reduction <add>, %36, %cst_12 [1, 2] : vector<1x8x1xf32> to vector<1xf32>
    %38 = vector.shape_cast %37 : vector<1xf32> to vector<1x1x1xf32>
    %39 = vector.extract %38[0, 0, 0] : f32 from vector<1x1x1xf32>
    %c0_13 = arith.constant 0 : index
    %c0_14 = arith.constant 0 : index
    %40 = memref.load %arg3[%c0_13, %c0_14] : memref<1x1xf32, #tpu.memory_space<smem>>
    memref.store %39, %arg3[%c0_13, %c0_14] : memref<1x1xf32, #tpu.memory_space<smem>>
    return
  }
  func.func @transform_0(%arg0: i32) -> (i32, i32) {
    %c0_i32 = arith.constant 0 : i32
    %c0_i32_0 = arith.constant 0 : i32
    return %arg0, %c0_i32 : i32, i32
  }
  func.func @transform_1(%arg0: i32) -> (i32, i32) {
    %c0_i32 = arith.constant 0 : i32
    %c0_i32_0 = arith.constant 0 : i32
    return %arg0, %c0_i32 : i32, i32
  }
  func.func @transform_2(%arg0: i32) -> (i32, i32) {
    %c0_i32 = arith.constant 0 : i32
    %c0_i32_0 = arith.constant 0 : i32
    return %arg0, %c0_i32 : i32, i32
  }
}

</mosaic_0001>

<bundles_post_ra>
// kernel: tpu_custom_call.1
= control target key start
LH: loop header
LB: loop body
LE: loop exit
PB: predicated region body
PF: predicated region fallthrough
CT: control target
= control target key end

     0   :  { %vm13_vm0 = vcmask 261120   ;;  %s139_s0 = inlined_call_operand.vmem [shape: f32[8,32], index: 0, kind: input, shape index: {}]   ;;  %s140_s1 = inlined_call_operand.vmem [shape: s32[8,1], index: 1, kind: input, shape index: {}]   ;;  %s141_s2 = inlined_call_operand.hbm [shape: f32[1,1], index: 2, kind: output, shape index: {}]  }
   0x1   :  { %v12_v0 = vld [vmem:[%s139_s0] sm:$0xff] }
   0x2   :  { %7 = vsyncpa [#allocation3], 0  ;;  %v14_v1 = vsel %vm13_vm0, %v12_v0, -inf  ;;  %v100_v2 = vmov 0   ;;  %v28_v3 = vld [vmem:[%s140_s1] sm:$0xff]  ;;  %v26_v7 = vlaneseq  ;;  %v37_v12 = vsel %vm13_vm0, %v12_v0, 0.0 }
   0x3   :  { %83 = vset.pattern.permute.xlu0 %v100_v2  ;;  %vm53_vm2 = vcmask 7168   ;;  %s88_s14 = scalar_lea.hbm %s141_s2, 16 }
   0x4   :  { %15 = vmax.xlane.f32.xlu0 %v14_v1  ;;  %v27_v8 = vand.u32 127, %v26_v7  ;;  %p89_p0 = scmp.ne.s32.totalorder %s141_s2, %s88_s14  ;;  %p92_p1 = scmp.lt.u32.totalorder %s88_s14, %s141_s2 }
   0x6   :  { %p94_p2 = pnand %p92_p1, %p89_p0 }
  0x1a   :  { %30 = vperm.xlu0 %83, %v28_v3  }
  0x91   :  { %v16_v4 = vpop.xlane.xlu0 %15 }
  0x92   :  { %v17_v5 = vsub.f32 %v12_v0, %v16_v4 }
  0x94   :  { %v18_v6 = vmul.f32 1.442695, %v17_v5 }
  0x96   :  { %84 = vpow2.f32 %v18_v6 }
  0x99   :  { %v31_v9 = vpop.permute.xlu0 %30 }
  0x9a   :  { %vm32_vm1 = vcmp.eq.s32.totalorder %v27_v8, %v31_v9 }
  0x9b   :  { %v33_v13 = vsel %vm32_vm1, %v12_v0, 0.0 }
  0x9c   :  { %v34_v14 = vsel %vm13_vm0, %v33_v13, 0.0 }
  0xa0   :  { %v85_v10 = vpop.eup %84 }
  0xa1   :  { %v20_v11 = vsel %vm13_vm0, %v85_v10, 0.0 }
  0xa2   :  { %21 = vadd.xlane.f32.xlu1 %v20_v11 }
  0xa6   :  { %38 = vadd.xlane.f32.xlu1 %v37_v12 }
  0xaa   :  { %35 = vadd.xlane.f32.xlu1 %v34_v14 }
 0x12f   :  { %v22_v15 = vpop.xlane.xlu1 %21 }
 0x130   :  { %86 = vlog2.f32 %v22_v15 }
 0x133   :  { %v39_v16 = vpop.xlane.xlu1 %38 }
 0x134   :  { %v41_v17 = vmul.f32 0.03125, %v39_v16 }
 0x136   :  { %v43_v19 = vmul.f32 0.1, %v41_v17 }
 0x137   :  { %v36_v18 = vpop.xlane.xlu1 %35 }
 0x138   :  { %v42_v20 = vmul.f32 0.9, %v36_v18 }
 0x13a   :  { %v87_v21 = vpop.eup %86  ;;  %v44_v23 = vadd.f32 %v43_v19, %v42_v20 }
 0x13b   :  { %v24_v22 = vmul.f32 0.6931472, %v87_v21 }
 0x13d   :  { %v25_v24 = vadd.f32 %v24_v22, %v16_v4 }
 0x13f   :  { %v45_v25 = vsub.f32 %v25_v24, %v44_v23 }
 0x141   :  { %v54_v26 = vsel %vm53_vm2, %v45_v25, 0.0 }
 0x142   :  { %55 = vadd.xlane.f32.xlu1 %v54_v26 }
 0x1cf   :  { %v56_v27 = vpop.xlane.xlu1 %55 }
 0x1d0   :  { %v57_v28 = vrot.slane %v56_v27, 4 }
 0x1d2   :  { %v58_v29 = vadd.f32 %v57_v28, %v56_v27 }
 0x1d4   :  { %v59_v30 = vrot.slane %v58_v29, 2 }
 0x1d6   :  { %v60_v31 = vadd.f32 %v59_v30, %v58_v29 }
 0x1d8   :  { %v61_v32 = vrot.slane %v60_v31, 1 }
 0x1da   :  { %v62_v33 = vadd.f32 %v61_v32, %v60_v31 }
 0x1dc   :  { %79 = vpush %v62_v33 }
 0x20d   :  { %s80_s0 = spop %79 }
 0x20e   :  { %65 = sst [smem:[#allocation2]] %s80_s0 }
 0x20f   :  { %97 = shalt.err (!%p94_p2)
}
 0x210   :  { %s101_s19 = smov [#allocation2]  }
 0x211   :  { %73 = dma.smem_to_hbm %s101_s19, 16, %s141_s2, [#allocation3]  }
 0x212   :  { %98 = dma.done.wait [#allocation3], 16  }
 0x213   :  { %99 = vsyncadd [#allocation3], 4294967280 }
 0x214   :  { %77 = sfence }
 0x215   :  { %78 = vsyncpa [#allocation3], 1 }

</bundles_post_ra>
